<compile_context>
chip_gen: v5e
topology: v5e:2x2
jax: 0.10.0
libtpu: 0.0.40
codegen_flags: <defaults>
</compile_context>

<pallas_src>
from functools import partial

import jax
import jax.numpy as jnp
from jax.experimental import pallas as pl
from jax.experimental.pallas import tpu as pltpu


def _round_up(n, m):
    return ((n + m - 1) // m) * m


def _mlp_fwd_kernel(x_ref, w1_ref, b1_ref, w2_ref, b2_ref, o_ref):
    """Fused Linear -> ReLU -> Linear on one (tm, *) batch tile.

    Weights/biases are VMEM-resident across grid steps (constant index_map).
    Biases are pre-broadcast to (tm, N) so the adds are pure element-wise VPU
    work; f32 accumulation on the MXU via preferred_element_type.
    """
    # Cast matmul operands to the weight dtype (no-op for f32; intentional
    # downcast for the bf16 MXU path on v6e/v7x).
    x = x_ref[...].astype(w1_ref.dtype)                          # (tm, Din_p)
    h = jnp.dot(x, w1_ref[...], preferred_element_type=jnp.float32)
    h = h + b1_ref[...]                                          # f32 bias add
    h = jnp.maximum(h, 0.0)                                      # ReLU (f32 VPU)
    h = h.astype(w2_ref.dtype)                                   # bf16 path only
    y = jnp.dot(h, w2_ref[...], preferred_element_type=jnp.float32)
    y = y + b2_ref[...]                                          # f32 bias add
    o_ref[...] = y.astype(o_ref.dtype)                           # lane-dense store


@partial(jax.jit, static_argnames=("out_features", "block_rows"))
def mlp_forward_pallas(x, w1, b1, w2, b2, *, out_features, block_rows=1024):
    """Batch-tiled pallas_call over the padded (lane-dense) MLP."""
    B, Din = x.shape
    Din_p, H_p = w1.shape
    Dout_p = w2.shape[1]

    # Pad the feature (contraction) dim once per call; zeros are exact.
    if Din < Din_p:
        x = jnp.pad(x, ((0, 0), (0, Din_p - Din)))

    # Batch tile: largest multiple of 8 sublanes up to block_rows.
    tm = min(block_rows, _round_up(B, 8))
    Bp = _round_up(B, tm)
    if Bp != B:
        x = jnp.pad(x, ((0, Bp - B), (0, 0)))
    grid = (Bp // tm,)

    # Pre-broadcast biases to full tile rows (VMEM-resident across all steps).
    b1_t = jnp.broadcast_to(b1.astype(jnp.float32), (tm, H_p))
    b2_t = jnp.broadcast_to(b2.astype(jnp.float32), (tm, Dout_p))

    itemsize = jnp.dtype(x.dtype).itemsize
    cost = pl.CostEstimate(
        flops=2 * Bp * (Din_p * H_p + H_p * Dout_p),
        bytes_accessed=(Bp * Din_p * itemsize
                        + w1.size * jnp.dtype(w1.dtype).itemsize
                        + w2.size * jnp.dtype(w2.dtype).itemsize
                        + (tm * H_p + tm * Dout_p) * 4
                        + Bp * Dout_p * itemsize),
        transcendentals=0,
    )

    out = pl.pallas_call(
        _mlp_fwd_kernel,
        out_shape=jax.ShapeDtypeStruct((Bp, Dout_p), x.dtype),
        grid_spec=pltpu.PrefetchScalarGridSpec(
            num_scalar_prefetch=0,
            grid=grid,
            in_specs=[
                pl.BlockSpec((tm, Din_p), lambda i: (i, 0)),     # x: batch-tiled
                pl.BlockSpec((Din_p, H_p), lambda i: (0, 0)),    # w1: resident
                pl.BlockSpec((tm, H_p), lambda i: (0, 0)),       # b1: resident
                pl.BlockSpec((H_p, Dout_p), lambda i: (0, 0)),   # w2: resident
                pl.BlockSpec((tm, Dout_p), lambda i: (0, 0)),    # b2: resident
            ],
            out_specs=pl.BlockSpec((tm, Dout_p), lambda i: (i, 0)),
        ),
        compiler_params=pltpu.CompilerParams(
            dimension_semantics=("parallel",)),  # v7x megacore; no-op v5e/v6e
        cost_estimate=cost,
    )(x, w1, b1_t, w2, b2_t)

    # Slice away batch + lane padding (output stayed lane-dense inside the kernel).
    return out[:B, :out_features]


class DPSplitModelPallas:
    """JAX/Pallas analogue of crypten.nn.privacy.DPSplitModel (forward only).

    Single-party simulation: this process acts as `feature_src`, so forward()
    runs the wrapped plaintext model as a fused Pallas kernel.
    """

    def __init__(self, in_features=32, hidden=64, out_features=16,
                 noise_magnitude=0.01, feature_src=0, label_src=0,
                 skip_loss_forward=True, cache_pred_size=True,
                 param_dtype=jnp.float32, block_rows=1024):
        self.noise_magnitude = noise_magnitude
        self.feature_src = feature_src
        self.label_src = label_src
        self.cache_pred_size = cache_pred_size
        self.skip_loss_forward = skip_loss_forward
        self.preds_size = None

        self.in_features = in_features
        self.hidden = hidden
        self.out_features = out_features
        self.block_rows = block_rows

        # Deterministic parameter init (synthetic weights, not a checkpoint).
        kw1, kb1, kw2, kb2 = jax.random.split(jax.random.PRNGKey(42), 4)
        s1 = 1.0 / jnp.sqrt(jnp.float32(in_features))
        s2 = 1.0 / jnp.sqrt(jnp.float32(hidden))
        w1 = jax.random.uniform(kw1, (in_features, hidden), jnp.float32,
                                minval=-1.0, maxval=1.0) * s1
        b1 = jax.random.uniform(kb1, (1, hidden), jnp.float32,
                                minval=-1.0, maxval=1.0) * s1
        w2 = jax.random.uniform(kw2, (hidden, out_features), jnp.float32,
                                minval=-1.0, maxval=1.0) * s2
        b2 = jax.random.uniform(kb2, (1, out_features), jnp.float32,
                                minval=-1.0, maxval=1.0) * s2

        # Pad feature dims to multiples of 128 once at init (lane-dense loads,
        # lane-dense stores, fuller MXU passes).  Zero-padding is exact.
        self.Din_p = _round_up(in_features, 128)
        self.H_p = _round_up(hidden, 128)
        self.Dout_p = _round_up(out_features, 128)

        # Matmul operands may be bf16 (v6e/v7x); biases stay f32 (v5e VPU/EUP
        # have no bf16, and bias adds are free filler under the MXU anyway).
        self.w1 = jnp.pad(w1, ((0, self.Din_p - in_features),
                               (0, self.H_p - hidden))).astype(param_dtype)
        self.b1 = jnp.pad(b1, ((0, 0), (0, self.H_p - hidden)))
        self.w2 = jnp.pad(w2, ((0, self.H_p - hidden),
                               (0, self.Dout_p - out_features))).astype(param_dtype)
        self.b2 = jnp.pad(b2, ((0, 0), (0, self.Dout_p - out_features)))

    def forward(self, x):
        # rank == feature_src branch: run the plaintext model in a Pallas kernel.
        preds = mlp_forward_pallas(
            x, self.w1, self.b1, self.w2, self.b2,
            out_features=self.out_features, block_rows=self.block_rows)

        # cache_pred_size semantics (local analogue of the broadcast_obj round).
        if self.cache_pred_size and self.preds_size is not None:
            if tuple(preds.shape) != self.preds_size:
                raise ValueError(
                    f"Prediction size does not match cached size: "
                    f"{tuple(preds.shape)} vs. {self.preds_size}")
        if self.preds_size is None:
            # TODO(synk): comm.broadcast_obj of preds_size to non-feature-src
            # parties is multi-party communication; no Pallas equivalent.
            self.preds_size = tuple(preds.shape)

        self.preds = preds
        return self.preds

    __call__ = forward


if __name__ == "__main__":
    batch, in_features, hidden, out_features = 8, 32, 64, 16

    key = jax.random.PRNGKey(0)
    x = jax.random.normal(key, (batch, in_features), dtype=jnp.float32)

    model = DPSplitModelPallas(in_features=in_features, hidden=hidden,
                               out_features=out_features,
                               noise_magnitude=0.01,
                               feature_src=0, label_src=0)

    preds = model(x)
    preds = jax.block_until_ready(preds)

    # Sanity check against plain-JAX reference on the unpadded logical weights.
    w1u = model.w1[:in_features, :hidden].astype(jnp.float32)
    b1u = model.b1[:, :hidden]
    w2u = model.w2[:hidden, :out_features].astype(jnp.float32)
    b2u = model.b2[:, :out_features]
    h_ref = jnp.maximum(x @ w1u + b1u, 0.0)
    ref = h_ref @ w2u + b2u

    assert preds.shape == (batch, out_features)
    assert jnp.allclose(preds, ref, atol=1e-5, rtol=1e-5)

    # Second call exercises the cached-prediction-size path.
    preds2 = jax.block_until_ready(model(x))
    assert preds2.shape == (batch, out_features)

    print("KERNEL_OK")
</pallas_src>

<mosaic_0001>
module attributes {stable_mosaic.version = 11 : i64} {
  func.func @_mlp_fwd_kernel(%arg0: i32, %arg1: memref<8x128xf32, #tpu.memory_space<vmem>>, %arg2: memref<128x128xf32, #tpu.memory_space<vmem>>, %arg3: memref<8x128xf32, #tpu.memory_space<vmem>>, %arg4: memref<128x128xf32, #tpu.memory_space<vmem>>, %arg5: memref<8x128xf32, #tpu.memory_space<vmem>>, %arg6: memref<8x128xf32, #tpu.memory_space<vmem>>) attributes {dimension_semantics = [#tpu.dimension_semantics<parallel>], iteration_bounds = array<i64: 1>, scalar_prefetch = 0 : i64, scratch_operands = 0 : i64, tpu.core_type = #tpu.core_type<tc>, window_params = [{transform_indices = @transform_0, window_bounds = array<i64: 8, 128>}, {pipeline_mode = #tpu.pipeline_mode<synchronous>, transform_indices = @transform_1, window_bounds = array<i64: 128, 128>}, {pipeline_mode = #tpu.pipeline_mode<synchronous>, transform_indices = @transform_2, window_bounds = array<i64: 8, 128>}, {pipeline_mode = #tpu.pipeline_mode<synchronous>, transform_indices = @transform_3, window_bounds = array<i64: 128, 128>}, {pipeline_mode = #tpu.pipeline_mode<synchronous>, transform_indices = @transform_4, window_bounds = array<i64: 8, 128>}, {transform_indices = @transform_5, window_bounds = array<i64: 8, 128>}]} {
    %c0 = arith.constant 0 : index
    %c0_0 = arith.constant 0 : index
    %0 = vector.load %arg1[%c0, %c0_0] : memref<8x128xf32, #tpu.memory_space<vmem>>, vector<8x128xf32>
    %c0_1 = arith.constant 0 : index
    %c0_2 = arith.constant 0 : index
    %1 = vector.load %arg2[%c0_1, %c0_2] : memref<128x128xf32, #tpu.memory_space<vmem>>, vector<128x128xf32>
    %cst = arith.constant dense<0.000000e+00> : vector<8x128xf32>
    %2 = tpu.matmul %0, %1, %cst {dimension_numbers = #tpu.dot_dimension_numbers<[1], [0], [0], [1], [0, 0, 1, 1], [], []>} : vector<8x128xf32>, vector<128x128xf32>, vector<8x128xf32> -> vector<8x128xf32>
    %c0_3 = arith.constant 0 : index
    %c0_4 = arith.constant 0 : index
    %3 = vector.load %arg3[%c0_3, %c0_4] : memref<8x128xf32, #tpu.memory_space<vmem>>, vector<8x128xf32>
    %4 = arith.addf %2, %3 : vector<8x128xf32>
    %cst_5 = arith.constant 0.000000e+00 : f32
    %5 = vector.broadcast %cst_5 : f32 to vector<8x128xf32>
    %6 = arith.maximumf %4, %5 : vector<8x128xf32>
    %c0_6 = arith.constant 0 : index
    %c0_7 = arith.constant 0 : index
    %7 = vector.load %arg4[%c0_6, %c0_7] : memref<128x128xf32, #tpu.memory_space<vmem>>, vector<128x128xf32>
    %cst_8 = arith.constant dense<0.000000e+00> : vector<8x128xf32>
    %8 = tpu.matmul %6, %7, %cst_8 {dimension_numbers = #tpu.dot_dimension_numbers<[1], [0], [0], [1], [0, 0, 1, 1], [], []>} : vector<8x128xf32>, vector<128x128xf32>, vector<8x128xf32> -> vector<8x128xf32>
    %c0_9 = arith.constant 0 : index
    %c0_10 = arith.constant 0 : index
    %9 = vector.load %arg5[%c0_9, %c0_10] : memref<8x128xf32, #tpu.memory_space<vmem>>, vector<8x128xf32>
    %10 = arith.addf %8, %9 : vector<8x128xf32>
    %c0_11 = arith.constant 0 : index
    %c0_12 = arith.constant 0 : index
    %11 = vector.load %arg6[%c0_11, %c0_12] : memref<8x128xf32, #tpu.memory_space<vmem>>, vector<8x128xf32>
    tpu.vector_store %arg6[%c0_11, %c0_12], %10 {strides = array<i32>} : memref<8x128xf32, #tpu.memory_space<vmem>>, vector<8x128xf32>,
    return
  }
  func.func @transform_0(%arg0: i32) -> (i32, i32) {
    %c0_i32 = arith.constant 0 : i32
    %c0_i32_0 = arith.constant 0 : i32
    return %arg0, %c0_i32 : i32, i32
  }
  func.func @transform_1(%arg0: i32) -> (i32, i32) {
    %c0_i32 = arith.constant 0 : i32
    %c0_i32_0 = arith.constant 0 : i32
    %c0_i32_1 = arith.constant 0 : i32
    return %c0_i32, %c0_i32_0 : i32, i32
  }
  func.func @transform_2(%arg0: i32) -> (i32, i32) {
    %c0_i32 = arith.constant 0 : i32
    %c0_i32_0 = arith.constant 0 : i32
    %c0_i32_1 = arith.constant 0 : i32
    return %c0_i32, %c0_i32_0 : i32, i32
  }
  func.func @transform_3(%arg0: i32) -> (i32, i32) {
    %c0_i32 = arith.constant 0 : i32
    %c0_i32_0 = arith.constant 0 : i32
    %c0_i32_1 = arith.constant 0 : i32
    return %c0_i32, %c0_i32_0 : i32, i32
  }
  func.func @transform_4(%arg0: i32) -> (i32, i32) {
    %c0_i32 = arith.constant 0 : i32
    %c0_i32_0 = arith.constant 0 : i32
    %c0_i32_1 = arith.constant 0 : i32
    return %c0_i32, %c0_i32_0 : i32, i32
  }
  func.func @transform_5(%arg0: i32) -> (i32, i32) {
    %c0_i32 = arith.constant 0 : i32
    %c0_i32_0 = arith.constant 0 : i32
    return %arg0, %c0_i32 : i32, i32
  }
}

</mosaic_0001>

<bundles_post_ra>
// kernel: mlp_forward_pallas.1
= control target key start
LH: loop header
LB: loop body
LE: loop exit
PB: predicated region body
PF: predicated region fallthrough
CT: control target
= control target key end

     0   :  { %10 = vsyncpa [#allocation3], 0  ;;  %s284_s0 = inlined_call_operand.vmem [shape: f32[8,128], index: 0, kind: input, shape index: {}]   ;;  %s285_s1 = inlined_call_operand.hbm [shape: f32[128,128], index: 1, kind: input, shape index: {}]   ;;  %s286_s2 = inlined_call_operand.vmem [shape: f32[8,128], index: 2, kind: input, shape index: {}]   ;;  %s287_s3 = inlined_call_operand.hbm [shape: f32[128,128], index: 3, kind: input, shape index: {}]   ;;  %s288_s4 = inlined_call_operand.vmem [shape: f32[8,128], index: 4, kind: input, shape index: {}]   ;;  %s289_s5 = inlined_call_operand.hbm [shape: f32[8,128], index: 5, kind: output, shape index: {}]  }
   0x1   :  { %11 = vsyncpa [#allocation6], 0 }
   0x2   :  { %12 = vsyncpa [#allocation4], 0  ;;  %s19_s20 = sshll.u32 %s285_s1, 4  ;;  %s231_s21 = smov [#allocation2]   ;;  %s20_s20 = int_to_ptr.hbm [resolvable:$true] %s19_s20 }
   0x3   :  { %s21_s22 = sshll.u32 %s231_s21, 4  ;;  %s34_s25 = sshll.u32 %s287_s3, 4  ;;  %s22_s22 = int_to_ptr.vmem [resolvable:$true] %s21_s22  ;;  %s35_s25 = int_to_ptr.hbm [resolvable:$true] %s34_s25 }
   0x4   :  { %s232_s26 = smov 128   ;;  %s233_s27 = smov 8  }
   0x5   :  { %27 = dma.hbm_to_vmem [thread:$0]  %s20_s20, 2048, %s22_s22, [#allocation3], %s232_s26, %s232_s26, %s233_s27  }
   0x6   :  { %s234_s28 = smov [#allocation5]  }
   0x7   :  { %s36_s29 = sshll.u32 %s234_s28, 4  ;;  %s37_s29 = int_to_ptr.vmem [resolvable:$true] %s36_s29 }
   0x8   :  { %42 = dma.hbm_to_vmem [thread:$0]  %s35_s25, 2048, %s37_s29, [#allocation6], %s232_s26, %s232_s26, %s233_s27  }
   0x9   :  { %225 = dma.done.wait [#allocation3], 2048  }
   0xa   :  { %226 = vsyncadd [#allocation3], 4294965248 }
   0xb   :  { %227 = dma.done.wait [#allocation6], 2048  }
   0xc   :  { %228 = vsyncadd [#allocation6], 4294965248  ;;  %v69_v0 = vld [vmem:[#allocation2 + $0x78] sm:$0xff]  ;;  %v68_v1 = vld [vmem:[#allocation2 + $0x70] sm:$0xff]  ;;  %s137_s12 = sshll.u32 %s289_s5, 4  ;;  %s138_s12 = int_to_ptr.hbm [resolvable:$true] %s137_s12 }
   0xd   :  { %71 = vmatpush.msra.mxu0 %v69_v0  ;;  %v67_v2 = vld [vmem:[#allocation2 + $0x68] sm:$0xff]  ;;  %v66_v3 = vld [vmem:[#allocation2 + $0x60] sm:$0xff]  ;;  %v107_v4 = vld [vmem:[#allocation5 + $0x78] sm:$0xff] }
   0xe   :  { %v65_v5 = vld [vmem:[#allocation2 + $0x58] sm:$0xff]  ;;  %109 = vmatpush.msra.mxu1 %v107_v4  ;;  %v106_v6 = vld [vmem:[#allocation5 + $0x70] sm:$0xff]  ;;  %v105_v7 = vld [vmem:[#allocation5 + $0x68] sm:$0xff] }
   0xf   :  { %72 = vmatpush.msra.mxu0 %v68_v1  ;;  %v64_v8 = vld [vmem:[#allocation2 + $0x50] sm:$0xff]  ;;  %v104_v9 = vld [vmem:[#allocation5 + $0x60] sm:$0xff]  ;;  %v63_v10 = vld [vmem:[#allocation2 + $0x48] sm:$0xff] }
  0x10   :  { %110 = vmatpush.msra.mxu1 %v106_v6  ;;  %v103_v11 = vld [vmem:[#allocation5 + $0x58] sm:$0xff]  ;;  %v62_v12 = vld [vmem:[#allocation2 + $0x40] sm:$0xff]  ;;  %v102_v13 = vld [vmem:[#allocation5 + $0x50] sm:$0xff] }
  0x11   :  { %73 = vmatpush.msra.mxu0 %v67_v2  ;;  %v61_v14 = vld [vmem:[#allocation2 + $0x38] sm:$0xff]  ;;  %v101_v15 = vld [vmem:[#allocation5 + $0x48] sm:$0xff]  ;;  %v60_v16 = vld [vmem:[#allocation2 + $0x30] sm:$0xff] }
  0x12   :  { %111 = vmatpush.msra.mxu1 %v105_v7  ;;  %v100_v17 = vld [vmem:[#allocation5 + $0x40] sm:$0xff]  ;;  %v59_v18 = vld [vmem:[#allocation2 + $0x28] sm:$0xff]  ;;  %v99_v19 = vld [vmem:[#allocation5 + $0x38] sm:$0xff] }
  0x13   :  { %74 = vmatpush.msra.mxu0 %v66_v3  ;;  %v58_v20 = vld [vmem:[#allocation2 + $0x20] sm:$0xff]  ;;  %v98_v21 = vld [vmem:[#allocation5 + $0x30] sm:$0xff]  ;;  %v57_v22 = vld [vmem:[#allocation2 + $0x18] sm:$0xff] }
  0x14   :  { %112 = vmatpush.msra.mxu1 %v104_v9  ;;  %v97_v23 = vld [vmem:[#allocation5 + $0x28] sm:$0xff]  ;;  %v56_v24 = vld [vmem:[#allocation2 + $0x10] sm:$0xff]  ;;  %v96_v25 = vld [vmem:[#allocation5 + $0x20] sm:$0xff] }
  0x15   :  { %75 = vmatpush.msra.mxu0 %v65_v5  ;;  %v55_v26 = vld [vmem:[#allocation2 + $0x8] sm:$0xff]  ;;  %v95_v27 = vld [vmem:[#allocation5 + $0x18] sm:$0xff]  ;;  %v54_v28 = vld [vmem:[#allocation2] sm:$0xff] }
  0x16   :  { %113 = vmatpush.msra.mxu1 %v103_v11  ;;  %v53_v29 = vld [vmem:[%s284_s0] sm:$0xff]  ;;  %v94_v30 = vld [vmem:[#allocation5 + $0x10] sm:$0xff]  ;;  %v93_v31 = vld [vmem:[#allocation5 + $0x8] sm:$0xff]  ;;  %s235_s0 = smov [#allocation7]  }
  0x17   :  { %76 = vmatpush.msra.mxu0 %v64_v8  ;;  %v92_v32 = vld [vmem:[#allocation5] sm:$0xff]  ;;  %s135_s9 = sshll.u32 %s235_s0, 4  ;;  %s136_s9 = int_to_ptr.vmem [resolvable:$true] %s135_s9 }
  0x18   :  { %114 = vmatpush.msra.mxu1 %v102_v13  ;;  %v70_v33 = vld [vmem:[%s286_s2] sm:$0xff] }
  0x19   :  { %77 = vmatpush.msra.mxu0 %v63_v10  ;;  %v108_v37 = vld [vmem:[%s288_s4] sm:$0xff] }
  0x1a   :  { %115 = vmatpush.msra.mxu1 %v101_v15 }
  0x1b   :  { %78 = vmatpush.msra.mxu0 %v62_v12 }
  0x1c   :  { %116 = vmatpush.msra.mxu1 %v100_v17 }
  0x1d   :  { %79 = vmatpush.msra.mxu0 %v61_v14 }
  0x1e   :  { %117 = vmatpush.msra.mxu1 %v99_v19 }
  0x1f   :  { %80 = vmatpush.msra.mxu0 %v60_v16 }
  0x20   :  { %118 = vmatpush.msra.mxu1 %v98_v21 }
  0x21   :  { %81 = vmatpush.msra.mxu0 %v59_v18 }
  0x22   :  { %119 = vmatpush.msra.mxu1 %v97_v23 }
  0x23   :  { %82 = vmatpush.msra.mxu0 %v58_v20 }
  0x24   :  { %120 = vmatpush.msra.mxu1 %v96_v25 }
  0x25   :  { %83 = vmatpush.msra.mxu0 %v57_v22 }
  0x26   :  { %121 = vmatpush.msra.mxu1 %v95_v27 }
  0x27   :  { %84 = vmatpush.msra.mxu0 %v56_v24 }
  0x28   :  { %122 = vmatpush.msra.mxu1 %v94_v30 }
  0x29   :  { %85 = vmatpush.msra.mxu0 %v55_v26 }
  0x2a   :  { %123 = vmatpush.msra.mxu1 %v93_v31 }
  0x2b   :  { %86 = vmatpush.msra.mxu0 %v54_v28 }
  0x2c   :  { %87 = vmatmul.f32.vlgmr.msra.gmra.mxu0 %v53_v29  ;;  %124 = vmatpush.msra.mxu1 %v92_v32 }
  0xa9   :  { %v88_v34 = vpop.f32.mrf.mxu0 }
  0xaa   :  { %v89_v35 = vadd.f32 %v88_v34, %v70_v33 }
  0xac   :  { %v91_v36 = vmax.f32 %v89_v35, 0.0 }
  0xae   :  { %125 = vmatmul.f32.vlgmr.msra.gmra.mxu1 %v91_v36 }
 0x12b   :  { %v126_v38 = vpop.f32.mrf.mxu1 }
 0x12c   :  { %v127_v39 = vadd.f32 %v126_v38, %v108_v37 }
 0x12e   :  { %129 = vst [vmem:[#allocation7] sm:$0xff] %v127_v39 }
 0x12f   :  { %140 = dma.vmem_to_hbm [thread:$0]  %s136_s9, 128, %s138_s12, [#allocation4]  }
 0x130   :  { %229 = dma.done.wait [#allocation4], 128  }
 0x131   :  { %230 = vsyncadd [#allocation4], 4294967168 }
 0x132   :  { %145 = vsyncpa [#allocation3], 1 }
 0x133   :  { %146 = vsyncpa [#allocation6], 1 }
 0x134   :  { %147 = vsyncpa [#allocation4], 1 }

</bundles_post_ra>
